<compile_context>
chip_gen: v5e
topology: v5e:2x2
jax: 0.10.0
libtpu: 0.0.40
codegen_flags: <defaults>
</compile_context>

<pallas_src>
import jax
import jax.numpy as jnp
from jax.experimental import pallas as pl
from jax.experimental.pallas import tpu as pltpu

EPS = 1e-12  # F.normalize default eps


def _prediction_kernel(x_ref, w_ref, local_out_ref, global_out_ref):
    # x_ref: [C, TM]   native channel-major feature tile (one batch, one spatial tile)
    # w_ref: [2N, C]   pre-normalized clusters; local half already scaled by sigma
    # local_out_ref / global_out_ref: [N, TM]
    x = x_ref[...].astype(jnp.float32)
    w = w_ref[...].astype(jnp.float32)

    # Single fused MXU matmul: [2N, C] @ [C, TM] -> [2N, TM]  (lane-dense result).
    prod = jnp.dot(w, x, preferred_element_type=jnp.float32)

    # F.normalize(x, dim=C) applied post-matmul as a per-column scale.
    norm = jnp.sqrt(jnp.sum(x * x, axis=0, keepdims=True))        # [1, TM]
    scaled = prod / jnp.maximum(norm, EPS)                        # [2N, TM]

    n = local_out_ref.shape[0]                                    # static N (multiple of 8)
    local_out_ref[...] = scaled[:n, :].astype(local_out_ref.dtype)
    global_out_ref[...] = scaled[n:, :].astype(global_out_ref.dtype)


def prediction_forward(x, local_clusters, global_clusters, sigma, *, tile_m=1024):
    """x: [B, C, H, W]; clusters: [N, C]; sigma: scalar (or None).

    Returns (inner_products_local, inner_products_global), each [B, N, H, W].
    """
    B, C, H, W = x.shape
    N, Cd = local_clusters.shape
    assert Cd == C
    HW = H * W

    # Zero-copy reshape: keep the native channel-major layout.
    x_flat = x.reshape(B, C, HW)

    # Hoisted (tiny) cluster normalization + sigma folding: done once in the
    # wrapper instead of every grid step inside the kernel.
    def _l2n(v):
        nrm = jnp.sqrt(jnp.sum(v * v, axis=-1, keepdims=True))
        return v / jnp.maximum(nrm, EPS)

    lcn = _l2n(local_clusters.astype(jnp.float32))
    gcn = _l2n(global_clusters.astype(jnp.float32))
    if sigma is not None:
        lcn = jnp.asarray(sigma, jnp.float32) * lcn
    w = jnp.concatenate([lcn, gcn], axis=0)                       # [2N, C]

    # Spatial (lane) tile: large, multiple of 128, or the full extent.
    tm = min(tile_m, HW)
    assert HW % tm == 0, "demo wrapper assumes H*W divisible by the spatial tile"
    grid = (B, HW // tm)

    out_local, out_global = pl.pallas_call(
        _prediction_kernel,
        out_shape=(
            jax.ShapeDtypeStruct((B, N, HW), jnp.float32),
            jax.ShapeDtypeStruct((B, N, HW), jnp.float32),
        ),
        grid_spec=pltpu.PrefetchScalarGridSpec(
            num_scalar_prefetch=0,
            grid=grid,
            in_specs=[
                # features: squeeze the batch dim, kernel sees [C, TM]
                pl.BlockSpec((None, C, tm), lambda b, j: (b, 0, j)),
                # fused, pre-normalized clusters (full, constant across steps)
                pl.BlockSpec((2 * N, C), lambda b, j: (0, 0)),
            ],
            out_specs=[
                pl.BlockSpec((None, N, tm), lambda b, j: (b, 0, j)),
                pl.BlockSpec((None, N, tm), lambda b, j: (b, 0, j)),
            ],
        ),
        compiler_params=pltpu.CompilerParams(
            dimension_semantics=("parallel", "parallel")),
    )(x_flat, w)

    # [B, N, HW] -> [B, N, H, W]: contiguous reshape, no transpose.
    return out_local.reshape(B, N, H, W), out_global.reshape(B, N, H, W)


def _reference(x, lc, gc, sigma):
    def l2n(v, axis):
        n = jnp.sqrt(jnp.sum(v * v, axis=axis, keepdims=True))
        return v / jnp.maximum(n, EPS)

    xn = l2n(x, axis=1)
    lcn = l2n(lc, axis=1)
    gcn = l2n(gc, axis=1)
    local = jnp.einsum("bchw,nc->bnhw", xn, lcn)
    glob = jnp.einsum("bchw,nc->bnhw", xn, gcn)
    if sigma is not None:
        local = sigma * local
    return local, glob


if __name__ == "__main__":
    # cfg.dim = 32 channels, n_classes = 16, cfg.alpha unused in forward.
    B, C, H, W = 2, 32, 16, 16
    N_CLASSES = 16

    key = jax.random.PRNGKey(0)
    kx, kc = jax.random.split(key, 2)

    # x: feature map, NCHW
    x = jax.random.normal(kx, (B, C, H, W), jnp.float32)

    # local_clusters: xavier_normal_ on randn(N, dim) -> std = sqrt(2/(N+dim)),
    # then F.normalize along dim=1 (done in init_global_clusters).
    std = jnp.sqrt(2.0 / (N_CLASSES + C))
    raw = std * jax.random.normal(kc, (N_CLASSES, C), jnp.float32)
    local_clusters = raw / jnp.maximum(
        jnp.sqrt(jnp.sum(raw * raw, axis=1, keepdims=True)), EPS
    )
    # global_clusters: clone of (normalized) local clusters at init.
    global_clusters = local_clusters

    # sigma=True branch: parameter filled with 1.0 (deterministic).
    sigma = jnp.float32(1.0)

    out_local, out_global = prediction_forward(x, local_clusters, global_clusters, sigma)
    jax.block_until_ready((out_local, out_global))

    ref_local, ref_global = _reference(x, local_clusters, global_clusters, sigma)
    assert out_local.shape == (B, N_CLASSES, H, W)
    assert out_global.shape == (B, N_CLASSES, H, W)
    assert jnp.allclose(out_local, ref_local, atol=1e-5, rtol=1e-5)
    assert jnp.allclose(out_global, ref_global, atol=1e-5, rtol=1e-5)

    print("KERNEL_OK")
</pallas_src>

<mosaic_0001>
module attributes {stable_mosaic.version = 11 : i64} {
  func.func @_prediction_kernel(%arg0: i32, %arg1: i32, %arg2: memref<1x32x256xf32, #tpu.memory_space<vmem>>, %arg3: memref<32x32xf32, #tpu.memory_space<vmem>>, %arg4: memref<1x16x256xf32, #tpu.memory_space<vmem>>, %arg5: memref<1x16x256xf32, #tpu.memory_space<vmem>>) attributes {dimension_semantics = [#tpu.dimension_semantics<parallel>, #tpu.dimension_semantics<parallel>], iteration_bounds = array<i64: 2, 1>, scalar_prefetch = 0 : i64, scratch_operands = 0 : i64, tpu.core_type = #tpu.core_type<tc>, window_params = [{transform_indices = @transform_0, window_bounds = array<i64: 1, 32, 256>}, {pipeline_mode = #tpu.pipeline_mode<synchronous>, transform_indices = @transform_1, window_bounds = array<i64: 32, 32>}, {transform_indices = @transform_2, window_bounds = array<i64: 1, 16, 256>}, {transform_indices = @transform_3, window_bounds = array<i64: 1, 16, 256>}]} {
    %c0 = arith.constant 0 : index
    %c0_0 = arith.constant 0 : index
    %c0_1 = arith.constant 0 : index
    %0 = vector.load %arg2[%c0, %c0_0, %c0_1] : memref<1x32x256xf32, #tpu.memory_space<vmem>>, vector<1x32x256xf32>
    %1 = vector.shape_cast %0 : vector<1x32x256xf32> to vector<32x256xf32>
    %c0_2 = arith.constant 0 : index
    %c0_3 = arith.constant 0 : index
    %2 = vector.load %arg3[%c0_2, %c0_3] : memref<32x32xf32, #tpu.memory_space<vmem>>, vector<32x32xf32>
    %cst = arith.constant dense<0.000000e+00> : vector<32x256xf32>
    %3 = tpu.matmul %2, %1, %cst {dimension_numbers = #tpu.dot_dimension_numbers<[1], [0], [0], [1], [0, 0, 1, 1], [], []>} : vector<32x32xf32>, vector<32x256xf32>, vector<32x256xf32> -> vector<32x256xf32>
    %4 = arith.mulf %1, %1 : vector<32x256xf32>
    %cst_4 = arith.constant dense<0.000000e+00> : vector<256xf32>
    %5 = vector.multi_reduction <add>, %4, %cst_4 [0] : vector<32x256xf32> to vector<256xf32>
    %6 = vector.shape_cast %5 : vector<256xf32> to vector<1x256xf32>
    %7 = math.sqrt %6 : vector<1x256xf32>
    %cst_5 = arith.constant 9.99999996E-13 : f32
    %8 = vector.broadcast %cst_5 : f32 to vector<1x256xf32>
    %9 = arith.maximumf %7, %8 : vector<1x256xf32>
    %10 = vector.broadcast %9 : vector<1x256xf32> to vector<32x256xf32>
    %11 = arith.divf %3, %10 : vector<32x256xf32>
    %12 = vector.extract_strided_slice %11 {offsets = [0, 0], sizes = [16, 256], strides = [1, 1]} : vector<32x256xf32> to vector<16x256xf32>
    %c0_6 = arith.constant 0 : index
    %c0_7 = arith.constant 0 : index
    %c0_8 = arith.constant 0 : index
    %13 = vector.load %arg4[%c0_6, %c0_7, %c0_8] : memref<1x16x256xf32, #tpu.memory_space<vmem>>, vector<1x16x256xf32>
    %14 = vector.shape_cast %13 : vector<1x16x256xf32> to vector<16x256xf32>
    %15 = vector.shape_cast %12 : vector<16x256xf32> to vector<1x16x256xf32>
    tpu.vector_store %arg4[%c0_6, %c0_7, %c0_8], %15 {strides = array<i32>} : memref<1x16x256xf32, #tpu.memory_space<vmem>>, vector<1x16x256xf32>,
    %16 = vector.extract_strided_slice %11 {offsets = [16, 0], sizes = [16, 256], strides = [1, 1]} : vector<32x256xf32> to vector<16x256xf32>
    %c0_9 = arith.constant 0 : index
    %c0_10 = arith.constant 0 : index
    %c0_11 = arith.constant 0 : index
    %17 = vector.load %arg5[%c0_9, %c0_10, %c0_11] : memref<1x16x256xf32, #tpu.memory_space<vmem>>, vector<1x16x256xf32>
    %18 = vector.shape_cast %17 : vector<1x16x256xf32> to vector<16x256xf32>
    %19 = vector.shape_cast %16 : vector<16x256xf32> to vector<1x16x256xf32>
    tpu.vector_store %arg5[%c0_9, %c0_10, %c0_11], %19 {strides = array<i32>} : memref<1x16x256xf32, #tpu.memory_space<vmem>>, vector<1x16x256xf32>,
    return
  }
  func.func @transform_0(%arg0: i32, %arg1: i32) -> (i32, i32, i32) {
    %c0_i32 = arith.constant 0 : i32
    %c0_i32_0 = arith.constant 0 : i32
    return %arg0, %c0_i32, %arg1 : i32, i32, i32
  }
  func.func @transform_1(%arg0: i32, %arg1: i32) -> (i32, i32) {
    %c0_i32 = arith.constant 0 : i32
    %c0_i32_0 = arith.constant 0 : i32
    %c0_i32_1 = arith.constant 0 : i32
    return %c0_i32, %c0_i32_0 : i32, i32
  }
  func.func @transform_2(%arg0: i32, %arg1: i32) -> (i32, i32, i32) {
    %c0_i32 = arith.constant 0 : i32
    %c0_i32_0 = arith.constant 0 : i32
    return %arg0, %c0_i32, %arg1 : i32, i32, i32
  }
  func.func @transform_3(%arg0: i32, %arg1: i32) -> (i32, i32, i32) {
    %c0_i32 = arith.constant 0 : i32
    %c0_i32_0 = arith.constant 0 : i32
    return %arg0, %c0_i32, %arg1 : i32, i32, i32
  }
}

</mosaic_0001>

<bundles_post_ra>
// kernel: tpu_custom_call.1
= control target key start
LH: loop header
LB: loop body
LE: loop exit
PB: predicated region body
PF: predicated region fallthrough
CT: control target
= control target key end

     0   :  { %s1123_s0 = inlined_call_operand.hbm [shape: f32[2,32,256], index: 0, kind: input, shape index: {}]   ;;  %s1124_s1 = inlined_call_operand.hbm [shape: f32[32,32], index: 1, kind: input, shape index: {}]   ;;  %s1125_s2 = inlined_call_operand.hbm [shape: f32[2,16,256], index: 2, kind: output, shape index: {0}]   ;;  %s1126_s3 = inlined_call_operand.hbm [shape: f32[2,16,256], index: 3, kind: output, shape index: {1}]  }
   0x1   :  { %1127 = sst [smem:[#allocation14_spill]] %s1124_s1 }
   0x2   :  { %9 = vsyncpa [#allocation3], 0 }
   0x3   :  { %11 = vsyncpa [#allocation3 + $0x1], 0 }
   0x4   :  { %12 = vsyncpa [#allocation6], 0 }
   0x5   :  { %13 = vsyncpa [#allocation4], 0 }
   0x6   :  { %15 = vsyncpa [#allocation4 + $0x1], 0 }
   0x7   :  { %16 = vsyncpa [#allocation9], 0 }
   0x8   :  { %18 = vsyncpa [#allocation9 + $0x1], 0  ;;  %s935_s12 = smov 0   ;;  %s937_s13 = smov 0  }
   0x9   :  { %s939_s14 = smov 0   ;;  %s941_s15 = smov 0  }
   0xa   :  { %s943_s16 = smov 0   ;;  %s945_s17 = smov 0  }
   0xb LB: > { %s596_s18 = sadd.s32 4294967295, %s906_s17   ;;  %s597_s19 = sadd.s32 4294967294, %s906_s17   ;;  %s906_s17 = sphi %s945_s17, %s24_s17   ;;  %s902_s16 = sphi %s943_s16, %s1140_s16   ;;  %s898_s15 = sphi %s941_s15, %s1139_s15   ;;  %s894_s14 = sphi %s939_s14, %s1138_s14   ;;  %s890_s13 = sphi %s937_s13, %s1137_s13   ;;  %s886_s12 = sphi %s935_s12, %s1136_s12  }
   0xc   : > { %p58_p0 = scmp.ne.s32.totalorder %s890_s13, %s886_s12  ;;  %p969_p1 = scmp.eq.s32.totalorder %s596_s18, 0 }
   0xd   : > { %p973_p2 = scmp.eq.s32.totalorder %s596_s18, 1  ;;  %p111_p3 = scmp.eq.s32.totalorder %s597_s19, 1 }
   0xe   : > { %p979_p4 = por %p969_p1, %p58_p0  ;;  %p598_p5 = scmp.ge.s32.totalorder %s906_s17, 1 }
   0xf   : > { %p984_p6 = por %p111_p3, %p58_p0  ;;  %p146_p7 = scmp.lt.s32.totalorder %s906_s17, 3 }
  0x10   : > { %s1132_s1 = sld [smem:[#allocation14_spill]]  ;;  %s908_s28 = smov [#allocation5]  }
  0x11   : > { %p992_p8 = pnand %p598_p5, %p146_p7  ;;  %s159_s29 = sshll.u32 %s908_s28, 4  ;;  %s160_s29 = int_to_ptr.vmem [resolvable:$true] %s159_s29 }
  0x12   : > { %p600_p11 = scmp.ge.s32.totalorder %s906_s17, 2  ;;  %s909_s30 = smov 128  }
  0x13   : > { %p646_p9 = pneg %p992_p8  ;;  %s910_s4 = smov 8  }
  0x14   : > { %s36_s5 = sadd.s32 1, %s902_s16  ;;  %s45_s6 = sadd.s32 1, %s894_s14 }
  0x15   : > { %p647_p10 = pnand %p646_p9, %p969_p1  ;;  %p38_p12 = scmp.ge.s32.totalorder %s36_s5, 2 }
  0x16   : > { %s157_s26 = sshll.u32 %s1132_s1, 4  ;;  %p52_p13 = scmp.ne.s32.totalorder %s894_s14, %s890_s13  ;;  %s158_s26 = int_to_ptr.hbm [resolvable:$true] %s157_s26 }
  0x17   : > { %649 = dma.hbm_to_vmem [thread:$0]  (!%p647_p10), %s158_s26, 512, %s160_s29, [#allocation6], %s909_s30, %s909_s30, %s910_s4  }
  0x18   : > { %p53_p0 = scmp.eq.s32.totalorder %s906_s17, 0  ;;  %s1142_s5 = smov (%p38_p12, %s36_s5), 0 }
  0x19   : > { %p1014_p5 = por %p973_p2, %p52_p13  ;;  %s40_s9 = ssub.s32 %s902_s16, %s1142_s5 }
  0x1a   : > { %p1008_p3 = por %p53_p0, %p52_p13  ;;  %p662_p7 = scmp.lt.s32.totalorder %s906_s17, 2 }
  0x1b   : > { %p43_p9 = scmp.eq.s32.totalorder %s40_s9, 0  ;;  %s173_s10 = sand.u32 1, %s894_s14  }
  0x1c   : > { %s601_s11 = sshll.u32 %s173_s10, 6  ;;  %s625_s19 = sshll.u32 %s902_s16, 6 }
  0x1d   : > { %s1023_s18 = scalar_select %p43_p9, %s894_s14, %s45_s6  }
  0x1e   : > { %s184_s26 = scalar_lea.hbm %s1123_s0, %s625_s19  ;;  %s177_s28 = scalar_lea.vmem [#allocation2], %s601_s11 }
  0x1f   : > { %s187_s29 = sshll.u32 %s177_s28, 4  ;;  %s185_s21 = sshll.u32 %s184_s26, 4  ;;  %s188_s29 = int_to_ptr.vmem [resolvable:$true] %s187_s29  ;;  %s186_s21 = int_to_ptr.hbm [resolvable:$true] %s185_s21 }
  0x20   : > { %p651_p2 = pnand %p662_p7, %p1008_p3  ;;  %s174_s30 = scalar_lea.sflag [#allocation3], %s173_s10 }
  0x21   : > { %s911_s4 = smov 256   ;;  %s912_s1 = smov 16  }
  0x22   : > { %653 = dma.hbm_to_vmem [thread:$0]  (!%p651_p2), %s186_s21, 1024, %s188_s29, %s174_s30, %s911_s4, %s911_s4, %s912_s1  }
  0x23   : > { %199 = sbr.rel (%p992_p8) target bundleno = 209 (0xd1), region = 28  ;;  %s1034_s6 = sand.u32 (!%p992_p8), 1, %s890_s13  }
  0x24   : > { %s605_s9 = sshll.u32 (!%p992_p8), %s1034_s6, 6  ;;  %s202_s11 = scalar_lea.sflag (!%p992_p8), [#allocation3], %s1034_s6 }
  0x25   : > { %s205_s19 = scalar_lea.vmem (!%p992_p8), [#allocation2], %s605_s9 }
  0x28   : > { %869 = dma.done.wait (%p979_p4), %s202_s11, 1024  }
  0x29   : > { %871 = vsyncadd (%p979_p4), %s202_s11, 4294966272 }
  0x2a   : > { %873 = dma.done.wait (%p969_p1), [#allocation6], 512  }
  0x2b   : > { %875 = vsyncadd (%p969_p1), [#allocation6], 4294966784  ;;  %v242_v0 = vld [vmem:[%s205_s19] sm:$0xff]  ;;  %v244_v1 = vld [vmem:[%s205_s19 + $0x10] sm:$0xff]  ;;  %vm254_vm0 = vcmask 261120   ;;  %s607_s1 = sshll.u32 %s1034_s6, 5 }
  0x2c   : > { %v246_v2 = vld [vmem:[%s205_s19 + $0x20] sm:$0xff]  ;;  %v248_v3 = vld [vmem:[%s205_s19 + $0x30] sm:$0xff]  ;;  %v325_v4 = vmul.f32 %v242_v0, %v242_v0  ;;  %v327_v5 = vmul.f32 %v244_v1, %v244_v1  ;;  %v243_v7 = vld [vmem:[%s205_s19 + $0x8] sm:$0xff]  ;;  %s626_s20 = sshll.u32 %s898_s15, 5  ;;  %s231_s22 = scalar_lea.vmem [#allocation7], %s607_s1 }
  0x2d   : > { %v329_v6 = vmul.f32 %v246_v2, %v246_v2  ;;  %v245_v8 = vld [vmem:[%s205_s19 + $0x18] sm:$0xff]  ;;  %628 = vmatpush.msra.mxu2 %v248_v3  ;;  %v247_v9 = vld [vmem:[%s205_s19 + $0x28] sm:$0xff]  ;;  %v326_v11 = vmul.f32 %v243_v7, %v243_v7  ;;  %279 = vmatpush.msra.mxu0 %v248_v3  ;;  %v331_v13 = vmul.f32 %v248_v3, %v248_v3  ;;  %v252_v20 = vld [vmem:[#allocation5 + $0x10] sm:$0xff]  ;;  %s440_s10 = scalar_lea.hbm %s1125_s2, %s626_s20  ;;  %s441_s24 = sshll.u32 %s231_s22, 4  ;;  %s1059_s24 = int_to_ptr.vmem [resolvable:$true] %s441_s24 }
  0x2e   : > { %v249_v10 = vld [vmem:[%s205_s19 + $0x38] sm:$0xff]  ;;  %v328_v12 = vmul.f32 %v245_v8, %v245_v8  ;;  %v333_v14 = vadd.f32 %v327_v5, %v325_v4  ;;  %v330_v15 = vmul.f32 %v247_v9, %v247_v9  ;;  %v250_v23 = vld [vmem:[#allocation5] sm:$0xff]  ;;  %v251_v25 = vld [vmem:[#allocation5 + $0x8] sm:$0xff]  ;;  %s443_s25 = sshll.u32 %s440_s10, 4  ;;  %s1061_s26 = scalar_lea.vmem [#allocation8], %s607_s1  ;;  %s444_s25 = int_to_ptr.hbm [resolvable:$true] %s443_s25 }
  0x2f   : > { %632 = vmatpush.msra.mxu3 %v249_v10  ;;  %308 = vmatpush.msra.mxu1 %v249_v10  ;;  %v332_v16 = vmul.f32 %v249_v10, %v249_v10  ;;  %v253_v24 = vld [vmem:[#allocation5 + $0x18] sm:$0xff]  ;;  %s460_s15 = sshll.u32 %s1061_s26, 4  ;;  %s1069_s21 = scalar_lea.hbm %s1126_s3, %s626_s20  ;;  %s1072_s15 = int_to_ptr.vmem [resolvable:$true] %s460_s15 }
  0x30   : > { %v342_v17 = vadd.f32 %v328_v12, %v326_v11  ;;  %629 = vmatpush.msra.mxu2 %v246_v2  ;;  %280 = vmatpush.msra.mxu0 %v246_v2  ;;  %v334_v18 = vadd.f32 %v333_v14, %v329_v6  ;;  %s462_s30 = sshll.u32 %s1069_s21, 4  ;;  %s422_s4 = scalar_lea.sflag [#allocation4], %s1034_s6  ;;  %s463_s30 = int_to_ptr.hbm [resolvable:$true] %s462_s30 }
  0x31   : > { %633 = vmatpush.msra.mxu3 %v247_v9  ;;  %309 = vmatpush.msra.mxu1 %v247_v9  ;;  %s802_s9 = sshra.s32 %s444_s25, 4  ;;  %s808_s20 = scalar_lea.hbm %s1125_s2, 64  ;;  %s803_s9 = int_to_ptr.hbm [resolvable:$true] %s802_s9 }
  0x32   : > { %v343_v19 = vadd.f32 %v342_v17, %v330_v15  ;;  %630 = vmatpush.msra.mxu2 %v244_v1  ;;  %281 = vmatpush.msra.mxu0 %v244_v1  ;;  %v335_v21 = vadd.f32 %v334_v18, %v331_v13  ;;  %s804_s11 = scalar_lea.hbm %s803_s9, 32  ;;  %p809_p10 = scmp.lt.s32.totalorder %s803_s9, %s1125_s2 }
  0x33   : > { %634 = vmatpush.msra.mxu3 %v245_v8  ;;  %310 = vmatpush.msra.mxu1 %v245_v8  ;;  %p805_p1 = scmp.ne.s32.totalorder %s803_s9, %s804_s11  ;;  %p810_p12 = scmp.lt.s32.totalorder %s808_s20, %s804_s11 }
  0x34   : > { %v344_v22 = vadd.f32 %v343_v19, %v332_v16  ;;  %631 = vmatpush.msra.mxu2 %v242_v0  ;;  %282 = vmatpush.msra.mxu0 %v242_v0  ;;  %v336_v26 = vrot.slane %v335_v21, 4 }
  0x35   : > { %635 = vmatpush.msra.mxu3 %v243_v7  ;;  %611 = vmatmul.msk.f32.vlgmr.msra.gmra.mxu2 %vm254_vm0, %v252_v20  ;;  %p806_p4 = pnand %p805_p1, %p1014_p5  ;;  %p811_p13 = por %p810_p12, %p809_p10 }
  0x36   : > { %615 = vmatmul.msk.f32.vlgmr.msra.gmra.mxu3 %vm254_vm0, %v252_v20  ;;  %311 = vmatpush.msra.mxu1 %v243_v7  ;;  %v345_v27 = vrot.slane %v344_v22, 4  ;;  %v337_v28 = vadd.f32 %v336_v26, %v335_v21 }
  0x37   : > { %609 = vmatmul.msk.f32.vlgmr.msra.gmra.mxu0 %vm254_vm0, %v250_v23  ;;  %613 = vmatmul.msk.f32.vlgmr.msra.gmra.mxu1 %vm254_vm0, %v250_v23  ;;  %p807_p8 = pneg %p806_p4 }
  0x38   : > { %v346_v29 = vadd.f32 %v345_v27, %v344_v22  ;;  %v338_v30 = vrot.slane %v337_v28, 2 }
  0x39   : > { %p812_p0 = pnand %p811_p13, %p807_p8 }
  0x3a   : > { %v347_v31 = vrot.slane %v346_v29, 2  ;;  %v339_v32 = vadd.f32 %v338_v30, %v337_v28 }
  0x3c   : > { %v348_v33 = vadd.f32 %v347_v31, %v346_v29  ;;  %v340_v34 = vrot.slane %v339_v32, 1 }
  0x3d   : > { %612 = vmatmul.msk.f32.gmra.mxu2 %vm254_vm0, %v253_v24 }
  0x3e   : > { %616 = vmatmul.msk.f32.gmra.mxu3 %vm254_vm0, %v253_v24  ;;  %v349_v35 = vrot.slane %v348_v33, 1  ;;  %v341_v36 = vadd.f32 %v340_v34, %v339_v32 }
  0x3f   : > { %610 = vmatmul.msk.f32.gmra.mxu0 %vm254_vm0, %v251_v25  ;;  %614 = vmatmul.msk.f32.gmra.mxu1 %vm254_vm0, %v251_v25 }
  0x40   : > { %v350_v37 = vadd.f32 %v349_v35, %v348_v33  ;;  %720 = vrsqrt.f32 %v341_v36  ;;  %vm358_vm1 = vcmp.eq.f32.partialorder %v341_v36, inf  ;;  %v361_v52 = vand.u32 2147483648, %v341_v36 }
  0x41   : > { %vm360_vm3 = vcmp.eq.f32.partialorder %v341_v36, 0.0 }
  0x42   : > { %722 = vrsqrt.f32 %v350_v37  ;;  %vm370_vm2 = vcmp.eq.f32.partialorder %v350_v37, inf  ;;  %v373_v54 = vand.u32 2147483648, %v350_v37  ;;  %vm372_vm4 = vcmp.eq.f32.partialorder %v350_v37, 0.0 }
  0x46   : > { %v721_v38 = vpop.eup %720 }
  0x47   : > { %v352_v40 = vmul.f32 %v721_v38, %v341_v36 }
  0x48   : > { %v723_v39 = vpop.eup %722 }
  0x49   : > { %v364_v41 = vmul.f32 %v723_v39, %v350_v37  ;;  %v353_v42 = vmul.f32 %v721_v38, %v352_v40 }
  0x4b   : > { %v365_v43 = vmul.f32 %v723_v39, %v364_v41  ;;  %v354_v44 = vmul.f32 0.5, %v353_v42 }
  0x4d   : > { %v366_v45 = vmul.f32 0.5, %v365_v43  ;;  %v355_v46 = vsub.f32 1.5, %v354_v44 }
  0x4f   : > { %v367_v47 = vsub.f32 1.5, %v366_v45  ;;  %v356_v48 = vmul.f32 %v721_v38, %v355_v46 }
  0x51   : > { %v368_v49 = vmul.f32 %v723_v39, %v367_v47  ;;  %v357_v50 = vmul.f32 %v356_v48, %v341_v36 }
  0x53   : > { %v369_v51 = vmul.f32 %v368_v49, %v350_v37  ;;  %v359_v53 = vsel %vm358_vm1, %v341_v36, %v357_v50 }
  0x54   : > { %v362_v56 = vsel %vm360_vm3, %v361_v52, %v359_v53 }
  0x55   : > { %v371_v55 = vsel %vm370_vm2, %v350_v37, %v369_v51  ;;  %v375_v58 = vmax.f32 %v362_v56, 1e-12 }
  0x56   : > { %v374_v57 = vsel %vm372_vm4, %v373_v54, %v371_v55 }
  0x57   : > { %v376_v59 = vmax.f32 %v374_v57, 1e-12  ;;  %724 = vrcp.f32 %v375_v58  ;;  %vm382_vm5 = vweird.f32 %v375_v58  ;;  %v388_v4 = vand.u32 2147483648, %v375_v58 }
  0x58   : > { %v386_v7 = vand.u32 2147483647, %v375_v58 }
  0x59   : > { %726 = vrcp.f32 %v376_v59  ;;  %vm397_vm7 = vweird.f32 %v376_v59  ;;  %v403_v5 = vand.u32 2147483648, %v376_v59  ;;  %v401_v9 = vand.u32 2147483647, %v376_v59 }
  0x5a   : > { %v389_v10 = vor.u32 1.1754944e-38, %v388_v4  ;;  %vm387_vm11 = vcmp.eq.f32.partialorder %v386_v7, 8.507059e+37 }
  0x5b   : > { %v404_v11 = vor.u32 1.1754944e-38, %v403_v5  ;;  %vm402_vm12 = vcmp.eq.f32.partialorder %v401_v9, 8.507059e+37 }
  0x5d   : > { %v725_v60 = vpop.eup %724 }
  0x5e   : > { %v378_v62 = vmul.f32 %v725_v60, %v375_v58  ;;  %vm383_vm6 = vweird.f32 %v725_v60 }
  0x5f   : > { %v727_v61 = vpop.eup %726  ;;  %vm384_vm9 = vmor %vm382_vm5, %vm383_vm6 }
  0x60   : > { %v393_v63 = vmul.f32 %v727_v61, %v376_v59  ;;  %v379_v0 = vsub.f32 1.0, %v378_v62  ;;  %vm398_vm8 = vweird.f32 %v727_v61 }
  0x61   : > { %vm399_vm10 = vmor %vm397_vm7, %vm398_vm8 }
  0x62   : > { %v394_v1 = vsub.f32 1.0, %v393_v63  ;;  %v380_v2 = vmul.f32 %v725_v60, %v379_v0 }
  0x64   : > { %v395_v3 = vmul.f32 %v727_v61, %v394_v1  ;;  %v381_v6 = vadd.f32 %v725_v60, %v380_v2 }
  0x66   : > { %v396_v8 = vadd.f32 %v727_v61, %v395_v3  ;;  %v385_v12 = vsel %vm384_vm9, %v725_v60, %v381_v6 }
  0x67   : > { %v390_v14 = vsel %vm387_vm11, %v389_v10, %v385_v12 }
  0x68   : > { %v400_v13 = vsel %vm399_vm10, %v727_v61, %v396_v8 }
  0x69   : > { %v405_v15 = vsel %vm402_vm12, %v404_v11, %v400_v13 }
  0xb4   : > { %v284_v16 = vpop.f32.mrf.mxu0  ;;  %v313_v17 = vpop.f32.mrf.mxu1 }
  0xb5   : > { %v391_v18 = vmul.f32 %v390_v14, %v284_v16  ;;  %v406_v19 = vmul.f32 %v405_v15, %v313_v17 }
  0xb7   : > { %413 = vst [vmem:[%s231_s22] sm:$0xff] %v391_v18 }
  0xb8   : > { %v290_v20 = vpop.f32.mrf.mxu2  ;;  %414 = vst [vmem:[%s231_s22 + $0x8] sm:$0xff] %v406_v19 }
  0xb9   : > { %v409_v21 = vmul.f32 %v390_v14, %v290_v20  ;;  %v319_v22 = vpop.f32.mrf.mxu3 }
  0xba   : > { %v410_v23 = vmul.f32 %v405_v15, %v319_v22 }
  0xbb   : > { %417 = vst [vmem:[%s1061_s26] sm:$0xff] %v409_v21 }
  0xbc   : > { %418 = vst [vmem:[%s1061_s26 + $0x8] sm:$0xff] %v410_v23  ;;  %v287_v24 = vpop.f32.mrf.mxu0  ;;  %v316_v25 = vpop.f32.mrf.mxu1 }
  0xbd   : > { %v407_v26 = vmul.f32 %v390_v14, %v287_v24  ;;  %v408_v27 = vmul.f32 %v405_v15, %v316_v25 }
  0xbf   : > { %415 = vst [vmem:[%s231_s22 + $0x10] sm:$0xff] %v407_v26 }
  0xc0   : > { %v293_v28 = vpop.f32.mrf.mxu2  ;;  %416 = vst [vmem:[%s231_s22 + $0x18] sm:$0xff] %v408_v27 }
  0xc1   : > { %v411_v29 = vmul.f32 %v390_v14, %v293_v28  ;;  %v322_v30 = vpop.f32.mrf.mxu3 }
  0xc2   : > { %815 = shalt.err (!%p812_p0)
}
  0xc3   : > { %s913_s22 = smov 256   ;;  %s914_s10 = smov 16   ;;  %v412_v31 = vmul.f32 %v405_v15, %v322_v30  ;;  %419 = vst [vmem:[%s1061_s26 + $0x10] sm:$0xff] %v411_v29 }
  0xc4   : > { %642 = dma.vmem_to_hbm [thread:$0]  (%p1014_p5), %s1059_s24, 512, %s444_s25, %s422_s4, %s913_s22, %s913_s22, %s914_s10  }
  0xc5   : > { %420 = vst [vmem:[%s1061_s26 + $0x18] sm:$0xff] %v412_v31  ;;  %s427_s28 = scalar_lea.sflag [#allocation9], %s1034_s6  ;;  %s830_s29 = sshra.s32 %s463_s30, 4  ;;  %s831_s29 = int_to_ptr.hbm [resolvable:$true] %s830_s29 }
  0xc6   : > { %s832_s21 = scalar_lea.hbm %s831_s29, 32  ;;  %s836_s19 = scalar_lea.hbm %s1126_s3, 64 }
  0xc7   : > { %p833_p3 = scmp.ne.s32.totalorder %s831_s29, %s832_s21  ;;  %p837_p2 = scmp.lt.s32.totalorder %s831_s29, %s1126_s3 }
  0xc8   : > { %p838_p1 = scmp.lt.s32.totalorder %s836_s19, %s832_s21 }
  0xc9   : > { %p834_p7 = pnand %p833_p3, %p1014_p5 }
  0xca   : > { %p839_p4 = por %p838_p1, %p837_p2 }
  0xcb   : > { %p835_p9 = pneg %p834_p7 }
  0xcd   : > { %p840_p8 = pnand %p839_p4, %p835_p9 }
  0xcf   : > { %843 = shalt.err (!%p840_p8)
}
  0xd0   : > { %643 = dma.vmem_to_hbm [thread:$0]  (%p1014_p5), %s1072_s15, 512, %s463_s30, %s427_s28, %s913_s22, %s913_s22, %s914_s10  }
  0xd1 PF: > { %s477_s6 = sand.u32 1, %s886_s12   ;;  %p655_p10 = pnand %p600_p11, %p984_p6 }
  0xd2   : > { %s478_s24 = scalar_lea.sflag [#allocation4], %s477_s6 }
  0xd3   : > { %p656_p12 = pneg %p655_p10 }
  0xd5   : > { %877 = dma.done.wait (%p656_p12), %s478_s24, 512  }
  0xd6   : > { %879 = vsyncadd (%p656_p12), %s478_s24, 4294966784  ;;  %s488_s25 = scalar_lea.sflag [#allocation9], %s477_s6 }
  0xd7   : > { %881 = dma.done.wait (%p656_p12), %s488_s25, 512  }
  0xd8   : > { %883 = vsyncadd (%p656_p12), %s488_s25, 4294966784  ;;  %s24_s17 = sadd.s32 1, %s906_s17   ;;  %s1136_s12 = smov %s890_s13 }
  0xd9   : > { %p21_p13 = scmp.ge.s32.totalorder %s24_s17, 4   ;;  %s1137_s13 = smov %s894_s14 }
  0xda   : > { %s1138_s14 = smov %s1023_s18  ;;  %s1139_s15 = smov %s902_s16 }
  0xdb   : > { %s1140_s16 = smov %s1142_s5  ;;  %23 = sbr.rel (!%p21_p13) target bundleno = 11 (0xb), region = 94 }
  0xe0   :  { %494 = vsyncpa [#allocation3], 1 }
  0xe1   :  { %496 = vsyncpa [#allocation3 + $0x1], 1 }
  0xe2   :  { %497 = vsyncpa [#allocation6], 1 }
  0xe3   :  { %498 = vsyncpa [#allocation4], 1 }
  0xe4   :  { %500 = vsyncpa [#allocation4 + $0x1], 1 }
  0xe5   :  { %501 = vsyncpa [#allocation9], 1 }
  0xe6   :  { %503 = vsyncpa [#allocation9 + $0x1], 1 }

</bundles_post_ra>
